<compile_context>
chip_gen: v7x
topology: tpu7x:2x2x1
jax: 0.10.0
libtpu: 0.0.40
codegen_flags: <defaults>
</compile_context>

<pallas_src>
import math

import jax
import jax.numpy as jnp
import numpy as np
from jax.experimental import pallas as pl
from jax.experimental.pallas import tpu as pltpu


# ----------------------------- Pallas kernel ------------------------------ #

def _mish(x):
    # mish(x) = x * tanh(softplus(x)) = x * s / (s + 2),  s = e^x (e^x + 2)
    # Single EUP exp + one (approx) EUP reciprocal instead of exp + log1p + tanh.
    # The clamp keeps s finite; the gate is already 1.0 to f32 precision far below 20.
    e = jnp.exp(jnp.minimum(x, 20.0))
    s = e * (e + 2.0)
    return x * (s * pl.reciprocal(s + 2.0, approx=True))


def _mlp_kernel(x_ref, w1_ref, b1_ref, w2_ref, b2_ref, w3_ref, b3_ref, out_ref):
    """Batch-on-lanes 3-layer MLP.

    x_ref  : (Kin, TB)   bf16  -- fused [x_flat | (temb) | state], transposed
    w*_ref : bf16 transposed weights (VMEM-resident across the batch grid)
    b*_ref : (dim, 1)    f32   column biases (layer-1 bias has the default-t
                                time path folded in)
    out_ref: (out, TB)   f32
    """
    f32 = jnp.float32
    bf16 = jnp.bfloat16

    # layer 1 (fused first-layer weight, single MXU push)
    h = jnp.dot(w1_ref[...], x_ref[...], preferred_element_type=f32) + b1_ref[...]
    h = _mish(h)

    # layer 2
    h = jnp.dot(w2_ref[...], h.astype(bf16), preferred_element_type=f32) + b2_ref[...]
    h = _mish(h)

    # output layer (lane-dense store across batch)
    out_ref[...] = jnp.dot(w3_ref[...], h.astype(bf16), preferred_element_type=f32) + b3_ref[...]


# Max batch lanes per grid step.  Per-step VMEM (double buffered):
#   in  : Kin(<=40) * 2048 * 2B * 2  ~ 320 KiB
#   out : 16        * 2048 * 4B * 2  ~ 256 KiB
# plus resident weights (a few KiB) -> far under the 32 MiB scoped / 64 MiB v7x VMEM.
_TILE_B_MAX = 2048


def _run_mlp_pallas(xin_t, w1_t, b1c, w2_t, b2c, w3_t, b3c):
    kin, B = xin_t.shape
    hidden = w2_t.shape[0]
    out_dim = w3_t.shape[0]

    if B <= _TILE_B_MAX:
        tile_b = B                      # block == full extent (no 128-alignment needed)
    else:
        tile_b = _TILE_B_MAX            # multiple of 128 -> lane-aligned tiles
    grid = (pl.cdiv(B, tile_b),)

    def resident(shape):
        # Weights/biases: same block every grid step -> stay VMEM-resident.
        return pl.BlockSpec(shape, lambda i: (0, 0))

    return pl.pallas_call(
        _mlp_kernel,
        out_shape=jax.ShapeDtypeStruct((out_dim, B), jnp.float32),
        grid=grid,
        in_specs=[
            pl.BlockSpec((kin, tile_b), lambda i: (0, i)),   # batch-tiled activations
            resident((hidden, kin)),  resident((hidden, 1)),
            resident((hidden, hidden)), resident((hidden, 1)),
            resident((out_dim, hidden)), resident((out_dim, 1)),
        ],
        out_specs=pl.BlockSpec((out_dim, tile_b), lambda i: (0, i)),
        compiler_params=pltpu.CompilerParams(
            dimension_semantics=("parallel",),   # batch tiles across v7x's 2 TensorCores
        ),
    )(xin_t, w1_t, b1c, w2_t, b2c, w3_t, b3c)


# ----------------------------- JAX glue ----------------------------------- #

def sinusoidal_pos_emb(t_flat, dim):
    """t_flat: (B,) -> (B, dim). Matches the standard SinusoidalPosEmb."""
    assert dim >= 4, "time_dim must be >= 4"
    half = dim // 2
    freqs = jnp.exp(jnp.arange(half, dtype=jnp.float32) * (-math.log(10000.0) / (half - 1)))
    emb = t_flat[:, None] * freqs[None, :]
    return jnp.concatenate([jnp.sin(emb), jnp.cos(emb)], axis=-1)


def _time_mlp(t_flat, p):
    """Sinusoidal featurization + Linear -> Mish -> Linear (pure JAX; tiny)."""
    def mish(v):
        return v * jnp.tanh(jax.nn.softplus(v))
    ts = sinusoidal_pos_emb(t_flat.astype(jnp.float32), p["wt1"].shape[0])
    return mish(ts @ p["wt1"] + p["bt1"]) @ p["wt2"] + p["bt2"]


def init_params(key, obs_dim, action_dim, horizon_steps, time_dim, hidden_dim):
    """Deterministic synthetic weights (not a checkpoint load)."""
    in_x = horizon_steps * action_dim
    out_dim = horizon_steps * action_dim
    ks = jax.random.split(key, 8)

    def lin(k, fan_in, fan_out):
        scale = 1.0 / math.sqrt(fan_in)
        return jax.random.uniform(k, (fan_in, fan_out), jnp.float32, -scale, scale)

    return {
        # time MLP
        "wt1": lin(ks[0], time_dim, 2 * time_dim),
        "bt1": jnp.zeros((1, 2 * time_dim), jnp.float32),
        "wt2": lin(ks[1], 2 * time_dim, time_dim),
        "bt2": jnp.zeros((1, time_dim), jnp.float32),
        # layer 1 (split across the concat [x_flat, time_emb, state])
        "w1x": lin(ks[2], in_x, hidden_dim),
        "w1t": lin(ks[3], time_dim, hidden_dim),
        "w1s": lin(ks[4], obs_dim, hidden_dim),
        "b1": jnp.zeros((1, hidden_dim), jnp.float32),
        # layer 2
        "w2": lin(ks[5], hidden_dim, hidden_dim),
        "b2": jnp.zeros((1, hidden_dim), jnp.float32),
        # output
        "w3": lin(ks[6], hidden_dim, out_dim),
        "b3": jnp.zeros((1, out_dim), jnp.float32),
    }


class CTConsistencyModelPallas:
    """JAX/Pallas port of CTConsistencyModel.forward."""

    def __init__(self, params, obs_dim, action_dim, horizon_steps, time_dim):
        self.params = params
        self.obs_dim = obs_dim
        self.action_dim = action_dim
        self.horizon_steps = horizon_steps
        self.time_dim = time_dim

        f32, bf16 = jnp.float32, jnp.bfloat16
        p = params
        hidden = p["w2"].shape[0]
        out_dim = p["w3"].shape[1]

        # Fused + transposed (feature-major) bf16 weights, prepared once.
        self._w1d_t = jnp.concatenate([p["w1x"], p["w1s"]], axis=0).T.astype(bf16)
        self._w1g_t = jnp.concatenate([p["w1x"], p["w1t"], p["w1s"]], axis=0).T.astype(bf16)
        self._w2_t = p["w2"].T.astype(bf16)
        self._w3_t = p["w3"].T.astype(bf16)

        # f32 column biases (broadcast over batch lanes inside the kernel).
        self._b2c = p["b2"].reshape(hidden, 1).astype(f32)
        self._b3c = p["b3"].reshape(out_dim, 1).astype(f32)

        # Default-t (t == ones) constant fold: the time MLP output and temb @ W1t are
        # identical for every row, so fold them into the layer-1 bias once, in f32.
        temb1 = _time_mlp(jnp.ones((1,), f32), p)                       # (1, time_dim)
        self._b1c_default = (p["b1"] + temb1 @ p["w1t"]).reshape(hidden, 1).astype(f32)
        self._b1c_general = p["b1"].reshape(hidden, 1).astype(f32)

    # ---- shared input preparation (layout + dtype policy) ----
    def _prep(self, cond, t, x, key):
        state = cond["state"].astype(jnp.float32)
        B = state.shape[0]
        if x is None:
            # TODO(synk): draw x in-kernel with pltpu.prng_seed / pltpu.stateful_normal
            # to skip the extra HBM round trip of the (B, Ta*Da) noise tensor.
            key = jax.random.PRNGKey(0) if key is None else key
            x = jax.random.normal(key, (B, self.horizon_steps, self.action_dim), jnp.float32)
        x_flat = x.reshape(B, self.horizon_steps * self.action_dim)

        if t is None:
            # Default t == ones: time path folded into the layer-1 bias.
            xin = jnp.concatenate([x_flat, state], axis=-1)
            w1_t, b1c = self._w1d_t, self._b1c_default
        else:
            # General per-row t: time MLP runs in the (tiny) JAX wrapper, its output is
            # concatenated and handled by the fused first-layer weight.
            temb = _time_mlp(t.reshape(B), self.params)
            xin = jnp.concatenate([x_flat, temb, state], axis=-1)
            w1_t, b1c = self._w1g_t, self._b1c_general

        # Batch-on-lanes layout + bf16 MXU operands (transpose once in the wrapper).
        xin_t = xin.T.astype(jnp.bfloat16)
        return xin_t, w1_t, b1c, B

    def forward(self, cond, deterministic=True, t=None, x=None, key=None):
        xin_t, w1_t, b1c, B = self._prep(cond, t, x, key)
        out_t = _run_mlp_pallas(xin_t, w1_t, b1c, self._w2_t, self._b2c, self._w3_t, self._b3c)
        # Sample(trajectories=out, chains=None) -> return the trajectories.
        return out_t.T.reshape(B, self.horizon_steps, self.action_dim)

    def forward_reference(self, cond, deterministic=True, t=None, x=None, key=None):
        """Pure-JAX reference with the kernel's dtype policy (bf16 MXU operands,
        f32 accumulate, exact Mish) — used to validate the Pallas port."""
        xin_t, w1_t, b1c, B = self._prep(cond, t, x, key)
        f32, bf16 = jnp.float32, jnp.bfloat16

        def mish(v):
            return v * jnp.tanh(jax.nn.softplus(v))

        h = jnp.dot(w1_t, xin_t, preferred_element_type=f32) + b1c
        h = mish(h)
        h = jnp.dot(self._w2_t, h.astype(bf16), preferred_element_type=f32) + self._b2c
        h = mish(h)
        out_t = jnp.dot(self._w3_t, h.astype(bf16), preferred_element_type=f32) + self._b3c
        return out_t.T.reshape(B, self.horizon_steps, self.action_dim)


# Full-precision (f32) reference implementing the original module math end-to-end.
def _reference_forward_f32(p, state, t, x_flat):
    def mish(v):
        return v * jnp.tanh(jax.nn.softplus(v))
    temb = _time_mlp(t.reshape(-1), p)
    h = mish(x_flat @ p["w1x"] + temb @ p["w1t"] + state @ p["w1s"] + p["b1"])
    h = mish(h @ p["w2"] + p["b2"])
    return h @ p["w3"] + p["b3"]


# ------------------------------ main -------------------------------------- #

if __name__ == "__main__":
    B = 2
    obs_dim = 8
    action_dim = 4
    horizon_steps = 4
    time_dim = 16
    hidden_dim = 32

    key = jax.random.PRNGKey(0)
    k_params, k_x = jax.random.split(key)

    params = init_params(k_params, obs_dim, action_dim, horizon_steps, time_dim, hidden_dim)
    model = CTConsistencyModelPallas(params, obs_dim, action_dim, horizon_steps, time_dim)

    cond = {"state": jnp.linspace(-1.0, 1.0, B * obs_dim, dtype=jnp.float32).reshape(B, obs_dim)}
    x = jax.random.normal(k_x, (B, horizon_steps, action_dim), jnp.float32)
    x_flat = x.reshape(B, horizon_steps * action_dim)

    # --- default-t path (t == ones, time MLP constant-folded into the layer-1 bias) ---
    out = jax.block_until_ready(model.forward(cond, x=x))
    ref_matched = model.forward_reference(cond, x=x)
    ref_f32 = _reference_forward_f32(
        params, cond["state"], jnp.ones((B, 1, 1), jnp.float32), x_flat).reshape(out.shape)
    # Matched reference shares the bf16 operand policy -> only the rational-Mish /
    # approx EUP reciprocal differ.
    np.testing.assert_allclose(np.asarray(out), np.asarray(ref_matched), rtol=2e-2, atol=2e-2)
    # f32 semantic reference: slack covers bf16 MXU operands + approx reciprocal.
    np.testing.assert_allclose(np.asarray(out), np.asarray(ref_f32), rtol=5e-2, atol=5e-2)

    # --- explicit per-row t path (general branch with concatenated time embedding) ---
    t_var = jnp.linspace(0.1, 1.0, B, dtype=jnp.float32).reshape(B, 1, 1)
    out2 = jax.block_until_ready(model.forward(cond, t=t_var, x=x))
    ref2_matched = model.forward_reference(cond, t=t_var, x=x)
    ref2_f32 = _reference_forward_f32(params, cond["state"], t_var, x_flat).reshape(out2.shape)
    np.testing.assert_allclose(np.asarray(out2), np.asarray(ref2_matched), rtol=2e-2, atol=2e-2)
    np.testing.assert_allclose(np.asarray(out2), np.asarray(ref2_f32), rtol=5e-2, atol=5e-2)

    print("KERNEL_OK")
</pallas_src>

<mosaic_0001>
module attributes {stable_mosaic.version = 11 : i64} {
  func.func @_mlp_kernel(%arg0: i32, %arg1: memref<24x2xbf16, #tpu.memory_space<vmem>>, %arg2: memref<32x24xbf16, #tpu.memory_space<vmem>>, %arg3: memref<32x1xf32, #tpu.memory_space<vmem>>, %arg4: memref<32x32xbf16, #tpu.memory_space<vmem>>, %arg5: memref<32x1xf32, #tpu.memory_space<vmem>>, %arg6: memref<16x32xbf16, #tpu.memory_space<vmem>>, %arg7: memref<16x1xf32, #tpu.memory_space<vmem>>, %arg8: memref<16x2xf32, #tpu.memory_space<vmem>>) attributes {dimension_semantics = [#tpu.dimension_semantics<parallel>], iteration_bounds = array<i64: 1>, scalar_prefetch = 0 : i64, scratch_operands = 0 : i64, tpu.core_type = #tpu.core_type<tc>, window_params = [{transform_indices = @transform_0, window_bounds = array<i64: 24, 2>}, {pipeline_mode = #tpu.pipeline_mode<synchronous>, transform_indices = @transform_1, window_bounds = array<i64: 32, 24>}, {pipeline_mode = #tpu.pipeline_mode<synchronous>, transform_indices = @transform_2, window_bounds = array<i64: 32, 1>}, {pipeline_mode = #tpu.pipeline_mode<synchronous>, transform_indices = @transform_3, window_bounds = array<i64: 32, 32>}, {pipeline_mode = #tpu.pipeline_mode<synchronous>, transform_indices = @transform_4, window_bounds = array<i64: 32, 1>}, {pipeline_mode = #tpu.pipeline_mode<synchronous>, transform_indices = @transform_5, window_bounds = array<i64: 16, 32>}, {pipeline_mode = #tpu.pipeline_mode<synchronous>, transform_indices = @transform_6, window_bounds = array<i64: 16, 1>}, {transform_indices = @transform_7, window_bounds = array<i64: 16, 2>}]} {
    %c0 = arith.constant 0 : index
    %c0_0 = arith.constant 0 : index
    %0 = vector.load %arg2[%c0, %c0_0] : memref<32x24xbf16, #tpu.memory_space<vmem>>, vector<32x24xbf16>
    %c0_1 = arith.constant 0 : index
    %c0_2 = arith.constant 0 : index
    %1 = vector.load %arg1[%c0_1, %c0_2] : memref<24x2xbf16, #tpu.memory_space<vmem>>, vector<24x2xbf16>
    %cst = arith.constant dense<0.000000e+00> : vector<32x2xf32>
    %2 = tpu.matmul %0, %1, %cst {dimension_numbers = #tpu.dot_dimension_numbers<[1], [0], [0], [1], [0, 0, 1, 1], [], []>} : vector<32x24xbf16>, vector<24x2xbf16>, vector<32x2xf32> -> vector<32x2xf32>
    %c0_3 = arith.constant 0 : index
    %c0_4 = arith.constant 0 : index
    %3 = vector.load %arg3[%c0_3, %c0_4] : memref<32x1xf32, #tpu.memory_space<vmem>>, vector<32x1xf32>
    %4 = vector.broadcast %3 : vector<32x1xf32> to vector<32x2xf32>
    %5 = arith.addf %2, %4 : vector<32x2xf32>
    %cst_5 = arith.constant 2.000000e+01 : f32
    %6 = vector.broadcast %cst_5 : f32 to vector<32x2xf32>
    %7 = arith.minimumf %5, %6 : vector<32x2xf32>
    %8 = math.exp %7 : vector<32x2xf32>
    %cst_6 = arith.constant 2.000000e+00 : f32
    %9 = vector.broadcast %cst_6 : f32 to vector<32x2xf32>
    %10 = arith.addf %8, %9 : vector<32x2xf32>
    %11 = arith.mulf %8, %10 : vector<32x2xf32>
    %cst_7 = arith.constant 2.000000e+00 : f32
    %12 = vector.broadcast %cst_7 : f32 to vector<32x2xf32>
    %13 = arith.addf %11, %12 : vector<32x2xf32>
    %14 = tpu.reciprocal %13 {approx = true} : vector<32x2xf32> -> vector<32x2xf32>
    %15 = arith.mulf %11, %14 : vector<32x2xf32>
    %16 = arith.mulf %5, %15 : vector<32x2xf32>
    %c0_8 = arith.constant 0 : index
    %c0_9 = arith.constant 0 : index
    %17 = vector.load %arg4[%c0_8, %c0_9] : memref<32x32xbf16, #tpu.memory_space<vmem>>, vector<32x32xbf16>
    %18 = arith.truncf %16 : vector<32x2xf32> to vector<32x2xbf16>
    %cst_10 = arith.constant dense<0.000000e+00> : vector<32x2xf32>
    %19 = tpu.matmul %17, %18, %cst_10 {dimension_numbers = #tpu.dot_dimension_numbers<[1], [0], [0], [1], [0, 0, 1, 1], [], []>} : vector<32x32xbf16>, vector<32x2xbf16>, vector<32x2xf32> -> vector<32x2xf32>
    %c0_11 = arith.constant 0 : index
    %c0_12 = arith.constant 0 : index
    %20 = vector.load %arg5[%c0_11, %c0_12] : memref<32x1xf32, #tpu.memory_space<vmem>>, vector<32x1xf32>
    %21 = vector.broadcast %20 : vector<32x1xf32> to vector<32x2xf32>
    %22 = arith.addf %19, %21 : vector<32x2xf32>
    %cst_13 = arith.constant 2.000000e+01 : f32
    %23 = vector.broadcast %cst_13 : f32 to vector<32x2xf32>
    %24 = arith.minimumf %22, %23 : vector<32x2xf32>
    %25 = math.exp %24 : vector<32x2xf32>
    %cst_14 = arith.constant 2.000000e+00 : f32
    %26 = vector.broadcast %cst_14 : f32 to vector<32x2xf32>
    %27 = arith.addf %25, %26 : vector<32x2xf32>
    %28 = arith.mulf %25, %27 : vector<32x2xf32>
    %cst_15 = arith.constant 2.000000e+00 : f32
    %29 = vector.broadcast %cst_15 : f32 to vector<32x2xf32>
    %30 = arith.addf %28, %29 : vector<32x2xf32>
    %31 = tpu.reciprocal %30 {approx = true} : vector<32x2xf32> -> vector<32x2xf32>
    %32 = arith.mulf %28, %31 : vector<32x2xf32>
    %33 = arith.mulf %22, %32 : vector<32x2xf32>
    %c0_16 = arith.constant 0 : index
    %c0_17 = arith.constant 0 : index
    %34 = vector.load %arg6[%c0_16, %c0_17] : memref<16x32xbf16, #tpu.memory_space<vmem>>, vector<16x32xbf16>
    %35 = arith.truncf %33 : vector<32x2xf32> to vector<32x2xbf16>
    %cst_18 = arith.constant dense<0.000000e+00> : vector<16x2xf32>
    %36 = tpu.matmul %34, %35, %cst_18 {dimension_numbers = #tpu.dot_dimension_numbers<[1], [0], [0], [1], [0, 0, 1, 1], [], []>} : vector<16x32xbf16>, vector<32x2xbf16>, vector<16x2xf32> -> vector<16x2xf32>
    %c0_19 = arith.constant 0 : index
    %c0_20 = arith.constant 0 : index
    %37 = vector.load %arg7[%c0_19, %c0_20] : memref<16x1xf32, #tpu.memory_space<vmem>>, vector<16x1xf32>
    %38 = vector.broadcast %37 : vector<16x1xf32> to vector<16x2xf32>
    %39 = arith.addf %36, %38 : vector<16x2xf32>
    %c0_21 = arith.constant 0 : index
    %c0_22 = arith.constant 0 : index
    %40 = vector.load %arg8[%c0_21, %c0_22] : memref<16x2xf32, #tpu.memory_space<vmem>>, vector<16x2xf32>
    tpu.vector_store %arg8[%c0_21, %c0_22], %39 {strides = array<i32>} : memref<16x2xf32, #tpu.memory_space<vmem>>, vector<16x2xf32>,
    return
  }
  func.func @transform_0(%arg0: i32) -> (i32, i32) {
    %c0_i32 = arith.constant 0 : i32
    %c0_i32_0 = arith.constant 0 : i32
    return %c0_i32, %arg0 : i32, i32
  }
  func.func @transform_1(%arg0: i32) -> (i32, i32) {
    %c0_i32 = arith.constant 0 : i32
    %c0_i32_0 = arith.constant 0 : i32
    %c0_i32_1 = arith.constant 0 : i32
    return %c0_i32, %c0_i32_0 : i32, i32
  }
  func.func @transform_2(%arg0: i32) -> (i32, i32) {
    %c0_i32 = arith.constant 0 : i32
    %c0_i32_0 = arith.constant 0 : i32
    %c0_i32_1 = arith.constant 0 : i32
    return %c0_i32, %c0_i32_0 : i32, i32
  }
  func.func @transform_3(%arg0: i32) -> (i32, i32) {
    %c0_i32 = arith.constant 0 : i32
    %c0_i32_0 = arith.constant 0 : i32
    %c0_i32_1 = arith.constant 0 : i32
    return %c0_i32, %c0_i32_0 : i32, i32
  }
  func.func @transform_4(%arg0: i32) -> (i32, i32) {
    %c0_i32 = arith.constant 0 : i32
    %c0_i32_0 = arith.constant 0 : i32
    %c0_i32_1 = arith.constant 0 : i32
    return %c0_i32, %c0_i32_0 : i32, i32
  }
  func.func @transform_5(%arg0: i32) -> (i32, i32) {
    %c0_i32 = arith.constant 0 : i32
    %c0_i32_0 = arith.constant 0 : i32
    %c0_i32_1 = arith.constant 0 : i32
    return %c0_i32, %c0_i32_0 : i32, i32
  }
  func.func @transform_6(%arg0: i32) -> (i32, i32) {
    %c0_i32 = arith.constant 0 : i32
    %c0_i32_0 = arith.constant 0 : i32
    %c0_i32_1 = arith.constant 0 : i32
    return %c0_i32, %c0_i32_0 : i32, i32
  }
  func.func @transform_7(%arg0: i32) -> (i32, i32) {
    %c0_i32 = arith.constant 0 : i32
    %c0_i32_0 = arith.constant 0 : i32
    return %c0_i32, %arg0 : i32, i32
  }
}

</mosaic_0001>

<bundles_post_ra>
// kernel: tpu_custom_call.1
= control target key start
LH: loop header
LB: loop body
LE: loop exit
PB: predicated region body
PF: predicated region fallthrough
CT: control target
= control target key end

     0   :  { %v469_v0 = vmov 0   ;;  %vm77_vm0 = vcmask 195584   ;;  %vm84_vm1 = vcmask 1043456   ;;  %vm213_vm2 = vcmask 261120   ;;  %s577_s0 = inlined_call_operand.vmem [shape: bf16[24,2], index: 0, kind: input, shape index: {}]   ;;  %s578_s1 = inlined_call_operand.vmem [shape: bf16[32,24], index: 1, kind: input, shape index: {}]   ;;  %s579_s2 = inlined_call_operand.vmem [shape: f32[32,1], index: 2, kind: input, shape index: {}]   ;;  %s580_s4 = inlined_call_operand.vmem [shape: f32[32,1], index: 4, kind: input, shape index: {}]   ;;  %s581_s6 = inlined_call_operand.vmem [shape: f32[16,1], index: 6, kind: input, shape index: {}]   ;;  %s582_s3 = inlined_call_operand.vmem [shape: bf16[32,32], index: 3, kind: input, shape index: {}]   ;;  %s583_s5 = inlined_call_operand.vmem [shape: bf16[16,32], index: 5, kind: input, shape index: {}]   ;;  %s584_s7 = inlined_call_operand.vmem [shape: f32[16,2], index: 7, kind: output, shape index: {}]  }
   0x1   :  { %428 = vset.pattern.permute.xlu0 %v469_v0  ;;  %429 = vset.pattern.permute.xlu1 %v469_v0  ;;  %v430_v1 = vld [vmem:[%s577_s0] sm:$0xff]   ;;  %v431_v2 = vld [vmem:[%s577_s0 + $0x8] ss:$0 sps:$4 sm:$0xff]   ;;  %v36_v5 = vld [vmem:[%s579_s2 + $0x10] sm:$0xff]  ;;  %vm471_vm3 = vmmov 0   ;;  %vm370_vm4 = vcmask 15360  }
   0x2   :  { %v432_v3 = vld [vmem:[%s578_s1] sm:$0xff]   ;;  %400 = vmatprep.subr.bf16.mxu0 %v430_v1  ;;  %v86_v6 = vsel %vm84_vm1, %v431_v2, 0  ;;  %50 = vperm.xlu1 %429, %v36_v5   ;;  %v35_v7 = vld [vmem:[%s579_s2 + $0x8] sm:$0xff]  ;;  %v37_v9 = vld [vmem:[%s579_s2 + $0x18] sm:$0xff] }
   0x3   :  { %v34_v4 = vld [vmem:[%s579_s2] sm:$0xff]  ;;  %401 = vmatpush3.bf16.msra.mxu0 %v430_v1  ;;  %404 = vmatprep.mubr.msk.bf16.mxu0 %vm77_vm0, %v432_v3  ;;  %v433_v8 = vld [vmem:[%s578_s1 + $0x8] sm:$0xff]   ;;  %v181_v12 = vld [vmem:[%s580_s4 + $0x10] sm:$0xff] }
   0x4   :  { %424 = vmatprep.subr.msk.bf16.mxu0 %vm84_vm1, %v431_v2  ;;  %40 = vperm.xlu0 %428, %v34_v4   ;;  %v179_v10 = vld [vmem:[%s580_s4] sm:$0xff]  ;;  %v180_v11 = vld [vmem:[%s580_s4 + $0x8] sm:$0xff]  ;;  %v182_v13 = vld [vmem:[%s580_s4 + $0x18] sm:$0xff]  ;;  %v470_v4 = vmov 0.0  }
   0x5   :  { %v309_v14 = vld [vmem:[%s581_s6] sm:$0xff]  ;;  %v310_v15 = vld [vmem:[%s581_s6 + $0x8] sm:$0xff] }
   0x6   :  { %55 = vperm.xlu1 %429, %v37_v9   ;;  %v434_v16 = vld [vmem:[%s582_s3] sm:$0xff]   ;;  %v435_v3 = vld [vmem:[%s582_s3 + $0x8] sm:$0xff]  }
   0x7   :  { %403 = vmatpush3.bf16.msra.mxu0 %v86_v6  ;;  %412 = vmatprep.mubr.msk.bf16.mxu1 %vm213_vm2, %v434_v16 }
   0x8   :  { %45 = vperm.xlu0 %428, %v35_v7   ;;  %416 = vmatprep.subr.bf16.mxu0 %v470_v4 }
   0xa   :  { %405 = vmatmul.mubr.msk.bf16.vlgmr.msra.gmra.mrb[0].mxu0 %vm77_vm0, %v433_v8  ;;  %190 = vperm.xlu1 %429, %v180_v11  }
   0xb   :  { %420 = vmatprep.mubr.msk.bf16.mxu0 %vm471_vm3, %v470_v4 }
   0xc   :  { %185 = vperm.xlu0 %428, %v179_v10  }
   0xe   :  { %200 = vperm.xlu1 %429, %v182_v13  }
  0x10   :  { %195 = vperm.xlu0 %428, %v181_v12  }
  0x12   :  { %318 = vperm.xlu1 %429, %v310_v15  }
  0x14   :  { %313 = vperm.xlu0 %428, %v309_v14  }
  0x81   :  { %v51_v17 = vpop.permute.xlu1 %50 }
  0x83   :  { %v41_v18 = vpop.permute.xlu0 %40 }
  0x85   :  { %v56_v22 = vpop.permute.xlu1 %55 }
  0x87   :  { %v46_v25 = vpop.permute.xlu0 %45 }
  0x89   :  { %v191_v6 = vpop.permute.xlu1 %190 }
  0x8b   :  { %v186_v5 = vpop.permute.xlu0 %185 }
  0x8d   :  { %v201_v11 = vpop.permute.xlu1 %200 }
  0x8f   :  { %v196_v7 = vpop.permute.xlu0 %195 }
  0xdd   :  { %v406_v19 = vpop.f32.mrb[0].mxu0 }
  0xde   :  { %v131_v20 = vadd.f32 %v406_v19, %v51_v17  ;;  %v122_v21 = vpop.f32.mrb[1].mxu0 }
  0xdf   :  { %v123_v23 = vadd.f32 %v122_v21, %v41_v18  ;;  %v407_v24 = vpop.f32.mrb[2].mxu0 }
  0xe0   :  { %v139_v26 = vmin.f32 %v131_v20, 20.0  ;;  %v134_v27 = vadd.f32 %v407_v24, %v56_v22  ;;  %v125_v28 = vpop.f32.mrb[3].mxu0 }
  0xe1   :  { %v137_v29 = vmin.f32 %v123_v23, 20.0  ;;  %v126_v30 = vadd.f32 %v125_v28, %v46_v25 }
  0xe2   :  { %v145_v31 = vmul.f32 1.442695, %v139_v26  ;;  %v140_v32 = vmin.f32 %v134_v27, 20.0 }
  0xe3   :  { %v141_v33 = vmul.f32 1.442695, %v137_v29  ;;  %v138_v34 = vmin.f32 %v126_v30, 20.0 }
  0xe4   :  { %437 = vpow2.f32 %v145_v31  ;;  %v147_v35 = vmul.f32 1.442695, %v140_v32 }
  0xe5   :  { %439 = vpow2.f32 %v141_v33  ;;  %v143_v36 = vmul.f32 1.442695, %v138_v34 }
  0xe6   :  { %441 = vpow2.f32 %v147_v35 }
  0xe7   :  { %443 = vpow2.f32 %v143_v36 }
  0xee   :  { %v438_v37 = vpop.eup %437 }
  0xef   :  { %v440_v38 = vpop.eup %439  ;;  %v151_v39 = vadd.f32 2.0, %v438_v37 }
  0xf0   :  { %v442_v40 = vpop.eup %441  ;;  %v149_v41 = vadd.f32 2.0, %v440_v38 }
  0xf1   :  { %v444_v42 = vpop.eup %443  ;;  %v155_v43 = vmul.f32 %v438_v37, %v151_v39  ;;  %v152_v44 = vadd.f32 2.0, %v442_v40 }
  0xf2   :  { %v153_v45 = vmul.f32 %v440_v38, %v149_v41  ;;  %v150_v46 = vadd.f32 2.0, %v444_v42 }
  0xf3   :  { %v159_v47 = vadd.f32 2.0, %v155_v43  ;;  %v156_v48 = vmul.f32 %v442_v40, %v152_v44 }
  0xf4   :  { %v157_v49 = vadd.f32 2.0, %v153_v45  ;;  %v154_v50 = vmul.f32 %v444_v42, %v150_v46 }
  0xf5   :  { %445 = vrcp.f32 %v159_v47  ;;  %v160_v51 = vadd.f32 2.0, %v156_v48 }
  0xf6   :  { %447 = vrcp.f32 %v157_v49  ;;  %v158_v52 = vadd.f32 2.0, %v154_v50 }
  0xf7   :  { %449 = vrcp.f32 %v160_v51 }
  0xf8   :  { %451 = vrcp.f32 %v158_v52 }
  0xff   :  { %v446_v53 = vpop.eup %445 }
 0x100   :  { %v448_v54 = vpop.eup %447  ;;  %v167_v55 = vmul.f32 %v446_v53, %v155_v43 }
 0x101   :  { %v450_v56 = vpop.eup %449  ;;  %v165_v57 = vmul.f32 %v448_v54, %v153_v45 }
 0x102   :  { %v452_v58 = vpop.eup %451  ;;  %v168_v59 = vmul.f32 %v450_v56, %v156_v48  ;;  %v171_v61 = vmul.f32 %v167_v55, %v131_v20  ;;  %v436_v55 = vld [vmem:[%s583_s5] sm:$0xff]   ;;  %v314_v56 = vpop.permute.xlu0 %313 }
 0x103   :  { %v166_v60 = vmul.f32 %v452_v58, %v154_v50  ;;  %v169_v63 = vmul.f32 %v165_v57, %v123_v23 }
 0x104   :  { %v172_v62 = vmul.f32 %v168_v59, %v134_v27 }
 0x105   :  { %v170_v0 = vmul.f32 %v166_v60, %v126_v30  ;;  %v319_v60 = vpop.permute.xlu1 %318 }
 0x106   :  { %v178_v1 = vpack.c.bf16 %v172_v62, %v171_v61 }
 0x107   :  { %v177_v2 = vpack.c.bf16 %v170_v0, %v169_v63 }
 0x109   :  { %408 = vmatprep.subr.bf16.mxu1 %v177_v2 }
 0x10a   :  { %409 = vmatpush3.bf16.msra.mxu1 %v177_v2 }
 0x10b   :  { %410 = vmatprep.subr.bf16.mxu1 %v178_v1 }
 0x10e   :  { %411 = vmatpush3.bf16.msra.mxu1 %v178_v1 }
 0x111   :  { %413 = vmatmul.mubr.msk.bf16.vlgmr.msra.gmra.mrb[0].mxu1 %vm213_vm2, %v435_v3 }
 0x1e4   :  { %v414_v8 = vpop.f32.mrb[0].mxu1 }
 0x1e5   :  { %v263_v9 = vadd.f32 %v414_v8, %v196_v7  ;;  %v254_v10 = vpop.f32.mrb[1].mxu1 }
 0x1e6   :  { %v255_v12 = vadd.f32 %v254_v10, %v186_v5  ;;  %v415_v13 = vpop.f32.mrb[2].mxu1 }
 0x1e7   :  { %v271_v14 = vmin.f32 %v263_v9, 20.0  ;;  %v266_v15 = vadd.f32 %v415_v13, %v201_v11  ;;  %v257_v16 = vpop.f32.mrb[3].mxu1 }
 0x1e8   :  { %v269_v17 = vmin.f32 %v255_v12, 20.0  ;;  %v258_v18 = vadd.f32 %v257_v16, %v191_v6 }
 0x1e9   :  { %v277_v19 = vmul.f32 1.442695, %v271_v14  ;;  %v272_v20 = vmin.f32 %v266_v15, 20.0 }
 0x1ea   :  { %v273_v21 = vmul.f32 1.442695, %v269_v17  ;;  %v270_v22 = vmin.f32 %v258_v18, 20.0 }
 0x1eb   :  { %453 = vpow2.f32 %v277_v19  ;;  %v279_v23 = vmul.f32 1.442695, %v272_v20 }
 0x1ec   :  { %455 = vpow2.f32 %v273_v21  ;;  %v275_v24 = vmul.f32 1.442695, %v270_v22 }
 0x1ed   :  { %457 = vpow2.f32 %v279_v23 }
 0x1ee   :  { %459 = vpow2.f32 %v275_v24 }
 0x1f5   :  { %v454_v25 = vpop.eup %453 }
 0x1f6   :  { %v456_v26 = vpop.eup %455  ;;  %v283_v27 = vadd.f32 2.0, %v454_v25 }
 0x1f7   :  { %v458_v28 = vpop.eup %457  ;;  %v281_v29 = vadd.f32 2.0, %v456_v26 }
 0x1f8   :  { %v460_v30 = vpop.eup %459  ;;  %v287_v31 = vmul.f32 %v454_v25, %v283_v27  ;;  %v284_v32 = vadd.f32 2.0, %v458_v28 }
 0x1f9   :  { %v285_v33 = vmul.f32 %v456_v26, %v281_v29  ;;  %v282_v34 = vadd.f32 2.0, %v460_v30 }
 0x1fa   :  { %v291_v35 = vadd.f32 2.0, %v287_v31  ;;  %v288_v36 = vmul.f32 %v458_v28, %v284_v32 }
 0x1fb   :  { %v289_v37 = vadd.f32 2.0, %v285_v33  ;;  %v286_v38 = vmul.f32 %v460_v30, %v282_v34 }
 0x1fc   :  { %461 = vrcp.f32 %v291_v35  ;;  %v292_v39 = vadd.f32 2.0, %v288_v36 }
 0x1fd   :  { %463 = vrcp.f32 %v289_v37  ;;  %v290_v40 = vadd.f32 2.0, %v286_v38 }
 0x1fe   :  { %465 = vrcp.f32 %v292_v39 }
 0x1ff   :  { %467 = vrcp.f32 %v290_v40 }
 0x206   :  { %v462_v41 = vpop.eup %461 }
 0x207   :  { %v464_v42 = vpop.eup %463  ;;  %v299_v43 = vmul.f32 %v462_v41, %v287_v31 }
 0x208   :  { %v466_v44 = vpop.eup %465  ;;  %v297_v45 = vmul.f32 %v464_v42, %v285_v33 }
 0x209   :  { %v468_v46 = vpop.eup %467  ;;  %v300_v47 = vmul.f32 %v466_v44, %v288_v36  ;;  %v303_v49 = vmul.f32 %v299_v43, %v263_v9 }
 0x20a   :  { %v298_v48 = vmul.f32 %v468_v46, %v286_v38  ;;  %v301_v51 = vmul.f32 %v297_v45, %v255_v12 }
 0x20b   :  { %v304_v50 = vmul.f32 %v300_v47, %v266_v15 }
 0x20c   :  { %v302_v52 = vmul.f32 %v298_v48, %v258_v18 }
 0x20d   :  { %v308_v53 = vpack.c.bf16 %v304_v50, %v303_v49 }
 0x20e   :  { %v307_v54 = vpack.c.bf16 %v302_v52, %v301_v51 }
 0x210   :  { %417 = vmatpush3.bf16.msra.mxu0 %v307_v54 }
 0x211   :  { %418 = vmatprep.subr.bf16.mxu0 %v470_v4 }
 0x214   :  { %419 = vmatpush3.bf16.msra.mxu0 %v308_v53 }
 0x217   :  { %421 = vmatmul.mubr.msk.bf16.vlgmr.msra.gmra.mrb[4].mxu0 %vm213_vm2, %v436_v55 }
 0x2ea   :  { %v363_v57 = vpop.f32.mrb[4].mxu0 }
 0x2eb   :  { %v364_v58 = vadd.f32 %v363_v57, %v314_v56  ;;  %v422_v59 = vpop.f32.mrb[5].mxu0 }
 0x2ec   :  { %v366_v61 = vpop.f32.mrb[6].mxu0 }
 0x2ed   :  { %371 = vst.msk [vmem:[%s584_s7] sm:$0xff] %vm370_vm4, %v364_v58  ;;  %v367_v62 = vadd.f32 %v366_v61, %v319_v60  ;;  %v423_v63 = vpop.f32.mrb[7].mxu0 }
 0x2ef   :  { %372 = vst.msk [vmem:[%s584_s7 + $0x8] sm:$0xff] %vm370_vm4, %v367_v62 }

</bundles_post_ra>
